<compile_context>
chip_gen: v5e
topology: v5e:2x2
jax: 0.10.0
libtpu: 0.0.40
codegen_flags: <defaults>
</compile_context>

<pallas_src>
import functools

import jax
import jax.numpy as jnp
from jax.experimental import pallas as pl
from jax.experimental.pallas import tpu as pltpu


def _gsw_kernel(x_ref, y_ref, theta_ref, o_ref, *, B, D):
    # ---- shared column normalization of theta (computed once) --------------
    theta = theta_ref[...].astype(jnp.float32)                  # [F, D]
    col_sumsq = jnp.sum(theta * theta, axis=0, keepdims=True)   # [1, D]
    # rsqrt (EUP) + epilogue multiply instead of sqrt + divide on the weights;
    # tiny epsilon guards an all-zero column (the PyTorch ref would NaN).
    inv_norm = jax.lax.rsqrt(jnp.maximum(col_sumsq, 1e-30))     # [1, D]

    # ---- fused projection of both inputs (MXU) ------------------------------
    xp = jnp.dot(x_ref[...].astype(jnp.float32), theta,
                 preferred_element_type=jnp.float32) * inv_norm     # [B, D]
    yp = jnp.dot(y_ref[...].astype(jnp.float32), theta,
                 preferred_element_type=jnp.float32) * inv_norm     # [B, D]

    # ---- fused ascending sort along D + MSE accumulation --------------------
    # D is tiny, so a fully-unrolled selection network (repeated lane
    # min-reduce + mask out exactly one occurrence) is pure VPU/XLU work and
    # avoids any data-dependent permutation / gather.
    lane = jax.lax.broadcasted_iota(jnp.int32, (B, D), 1).astype(jnp.float32)

    def extract_min(a):
        m = jnp.min(a, axis=-1, keepdims=True)                       # [B, 1]
        # index of the first occurrence of the row minimum
        first = jnp.min(jnp.where(a == m, lane, float(D)),
                        axis=-1, keepdims=True)                      # [B, 1]
        a = jnp.where(lane == first, jnp.inf, a)                     # remove it
        return m, a

    sse = jnp.zeros((B, 1), jnp.float32)
    for _ in range(D):            # static unroll: D extract/compare stages
        mx, xp = extract_min(xp)  # r-th smallest of each x_proj row
        my, yp = extract_min(yp)  # r-th smallest of each y_proj row
        d = mx - my
        sse = sse + d * d

    o_ref[0, 0] = jnp.sum(sse) * (1.0 / (B * D))


def grt_gsw(x, y, theta):
    """GRT.gsw with a LinearGRT-style projection (explicit theta, MSE loss),
    fused into a single Pallas kernel producing one SMEM scalar."""
    assert x.shape == y.shape
    B, F = x.shape
    F2, D = theta.shape
    assert F == F2

    cost = pl.CostEstimate(
        flops=4 * B * F * D + 16 * B * D * D,   # 2 projections + sort network
        transcendentals=D,                      # rsqrt of the column norms
        bytes_accessed=4 * (2 * B * F + F * D) + 4,
    )

    out = pl.pallas_call(
        functools.partial(_gsw_kernel, B=B, D=D),
        out_shape=jax.ShapeDtypeStruct((1, 1), jnp.float32),
        grid=(1,),
        in_specs=[
            pl.BlockSpec((B, F), lambda i: (0, 0)),
            pl.BlockSpec((B, F), lambda i: (0, 0)),
            pl.BlockSpec((F, D), lambda i: (0, 0)),
        ],
        out_specs=pl.BlockSpec((1, 1), lambda i: (0, 0),
                               memory_space=pltpu.MemorySpace.SMEM),
        compiler_params=pltpu.CompilerParams(
            dimension_semantics=("arbitrary",)),
        cost_estimate=cost,
    )(x, y, theta)
    return out[0, 0]


def nngrt_forward(x):
    # TODO(synk): NNGRT.forward is an empty stub (`pass`) in the reference;
    #             there is no compute to translate — return None to match it.
    return None


if __name__ == "__main__":
    key = jax.random.PRNGKey(0)
    k_x, k_y, k_t = jax.random.split(key, 3)

    B, F, D = 8, 32, 16  # batch, in_features, directions

    x = jax.random.normal(k_x, (B, F), dtype=jnp.float32)
    y = jax.random.normal(k_y, (B, F), dtype=jnp.float32)
    # deterministic "parameter" (LinearGRT.theta is randn(in_features, directions))
    theta = jax.random.normal(k_t, (F, D), dtype=jnp.float32)

    # NNGRT.forward is a stub; exercise the GRT.gsw compute path instead.
    assert nngrt_forward(x) is None

    loss = grt_gsw(x, y, theta)
    loss = jax.block_until_ready(loss)

    # plain-JAX reference (canonical normalize-then-project formulation)
    dirs = theta / jnp.linalg.norm(theta, axis=0, keepdims=True)
    xs_ref = jnp.sort(x @ dirs, axis=-1)
    ys_ref = jnp.sort(y @ dirs, axis=-1)
    ref = jnp.mean((xs_ref - ys_ref) ** 2)

    # Tolerance note: TPU f32 matmuls may run as bf16 passes at DEFAULT
    # precision, and the kernel applies the 1/||theta||_col scale to the
    # matmul *output* (epilogue) rather than normalizing theta, so operand
    # rounding differs slightly from the reference path.
    assert jnp.allclose(loss, ref, rtol=2e-2, atol=1e-3), (loss, ref)

    print("KERNEL_OK")
</pallas_src>

<mosaic_0001>
module attributes {stable_mosaic.version = 11 : i64} {
  func.func @_gsw_kernel(%arg0: i32, %arg1: memref<8x32xf32, #tpu.memory_space<vmem>>, %arg2: memref<8x32xf32, #tpu.memory_space<vmem>>, %arg3: memref<32x16xf32, #tpu.memory_space<vmem>>, %arg4: memref<1x1xf32, #tpu.memory_space<smem>>) attributes {dimension_semantics = [#tpu.dimension_semantics<arbitrary>], iteration_bounds = array<i64: 1>, scalar_prefetch = 0 : i64, scratch_operands = 0 : i64, tpu.core_type = #tpu.core_type<tc>, window_params = [{pipeline_mode = #tpu.pipeline_mode<synchronous>, transform_indices = @transform_0, window_bounds = array<i64: 8, 32>}, {pipeline_mode = #tpu.pipeline_mode<synchronous>, transform_indices = @transform_1, window_bounds = array<i64: 8, 32>}, {pipeline_mode = #tpu.pipeline_mode<synchronous>, transform_indices = @transform_2, window_bounds = array<i64: 32, 16>}, {transform_indices = @transform_3, window_bounds = array<i64: 1, 1>}]} {
    %c0 = arith.constant 0 : index
    %c0_0 = arith.constant 0 : index
    %0 = vector.load %arg3[%c0, %c0_0] : memref<32x16xf32, #tpu.memory_space<vmem>>, vector<32x16xf32>
    %1 = arith.mulf %0, %0 : vector<32x16xf32>
    %cst = arith.constant dense<0.000000e+00> : vector<16xf32>
    %2 = vector.multi_reduction <add>, %1, %cst [0] : vector<32x16xf32> to vector<16xf32>
    %3 = vector.shape_cast %2 : vector<16xf32> to vector<1x16xf32>
    %cst_1 = arith.constant 1.000000e-30 : f32
    %4 = vector.broadcast %cst_1 : f32 to vector<1x16xf32>
    %5 = arith.maximumf %3, %4 : vector<1x16xf32>
    %6 = math.rsqrt %5 : vector<1x16xf32>
    %c0_2 = arith.constant 0 : index
    %c0_3 = arith.constant 0 : index
    %7 = vector.load %arg1[%c0_2, %c0_3] : memref<8x32xf32, #tpu.memory_space<vmem>>, vector<8x32xf32>
    %cst_4 = arith.constant dense<0.000000e+00> : vector<8x16xf32>
    %8 = tpu.matmul %7, %0, %cst_4 {dimension_numbers = #tpu.dot_dimension_numbers<[1], [0], [0], [1], [0, 0, 1, 1], [], []>} : vector<8x32xf32>, vector<32x16xf32>, vector<8x16xf32> -> vector<8x16xf32>
    %9 = vector.broadcast %6 : vector<1x16xf32> to vector<8x16xf32>
    %10 = arith.mulf %8, %9 : vector<8x16xf32>
    %c0_5 = arith.constant 0 : index
    %c0_6 = arith.constant 0 : index
    %11 = vector.load %arg2[%c0_5, %c0_6] : memref<8x32xf32, #tpu.memory_space<vmem>>, vector<8x32xf32>
    %cst_7 = arith.constant dense<0.000000e+00> : vector<8x16xf32>
    %12 = tpu.matmul %11, %0, %cst_7 {dimension_numbers = #tpu.dot_dimension_numbers<[1], [0], [0], [1], [0, 0, 1, 1], [], []>} : vector<8x32xf32>, vector<32x16xf32>, vector<8x16xf32> -> vector<8x16xf32>
    %13 = vector.broadcast %6 : vector<1x16xf32> to vector<8x16xf32>
    %14 = arith.mulf %12, %13 : vector<8x16xf32>
    %15 = tpu.iota {dimensions = array<i32: 1>} : vector<8x16xi32>
    %16 = arith.sitofp %15 : vector<8x16xi32> to vector<8x16xf32>
    %cst_8 = arith.constant 0.000000e+00 : f32
    %17 = vector.broadcast %cst_8 : f32 to vector<8x1xf32>
    %cst_9 = arith.constant dense<0x7F800000> : vector<8xf32>
    %18 = vector.multi_reduction <minimumf>, %10, %cst_9 [1] : vector<8x16xf32> to vector<8xf32>
    %19 = vector.shape_cast %18 : vector<8xf32> to vector<8x1xf32>
    %20 = vector.broadcast %19 : vector<8x1xf32> to vector<8x16xf32>
    %21 = arith.cmpf oeq, %10, %20 : vector<8x16xf32>
    %cst_10 = arith.constant 1.600000e+01 : f32
    %22 = vector.broadcast %cst_10 : f32 to vector<8x16xf32>
    %23 = arith.select %21, %16, %22 : vector<8x16xi1>, vector<8x16xf32>
    %cst_11 = arith.constant dense<0x7F800000> : vector<8xf32>
    %24 = vector.multi_reduction <minimumf>, %23, %cst_11 [1] : vector<8x16xf32> to vector<8xf32>
    %25 = vector.shape_cast %24 : vector<8xf32> to vector<8x1xf32>
    %26 = vector.broadcast %25 : vector<8x1xf32> to vector<8x16xf32>
    %27 = arith.cmpf oeq, %16, %26 : vector<8x16xf32>
    %cst_12 = arith.constant 0x7F800000 : f32
    %28 = vector.broadcast %cst_12 : f32 to vector<8x16xf32>
    %29 = arith.select %27, %28, %10 : vector<8x16xi1>, vector<8x16xf32>
    %cst_13 = arith.constant dense<0x7F800000> : vector<8xf32>
    %30 = vector.multi_reduction <minimumf>, %14, %cst_13 [1] : vector<8x16xf32> to vector<8xf32>
    %31 = vector.shape_cast %30 : vector<8xf32> to vector<8x1xf32>
    %32 = vector.broadcast %31 : vector<8x1xf32> to vector<8x16xf32>
    %33 = arith.cmpf oeq, %14, %32 : vector<8x16xf32>
    %cst_14 = arith.constant 1.600000e+01 : f32
    %34 = vector.broadcast %cst_14 : f32 to vector<8x16xf32>
    %35 = arith.select %33, %16, %34 : vector<8x16xi1>, vector<8x16xf32>
    %cst_15 = arith.constant dense<0x7F800000> : vector<8xf32>
    %36 = vector.multi_reduction <minimumf>, %35, %cst_15 [1] : vector<8x16xf32> to vector<8xf32>
    %37 = vector.shape_cast %36 : vector<8xf32> to vector<8x1xf32>
    %38 = vector.broadcast %37 : vector<8x1xf32> to vector<8x16xf32>
    %39 = arith.cmpf oeq, %16, %38 : vector<8x16xf32>
    %cst_16 = arith.constant 0x7F800000 : f32
    %40 = vector.broadcast %cst_16 : f32 to vector<8x16xf32>
    %41 = arith.select %39, %40, %14 : vector<8x16xi1>, vector<8x16xf32>
    %42 = arith.subf %19, %31 : vector<8x1xf32>
    %43 = arith.mulf %42, %42 : vector<8x1xf32>
    %44 = arith.addf %17, %43 : vector<8x1xf32>
    %cst_17 = arith.constant dense<0x7F800000> : vector<8xf32>
    %45 = vector.multi_reduction <minimumf>, %29, %cst_17 [1] : vector<8x16xf32> to vector<8xf32>
    %46 = vector.shape_cast %45 : vector<8xf32> to vector<8x1xf32>
    %47 = vector.broadcast %46 : vector<8x1xf32> to vector<8x16xf32>
    %48 = arith.cmpf oeq, %29, %47 : vector<8x16xf32>
    %cst_18 = arith.constant 1.600000e+01 : f32
    %49 = vector.broadcast %cst_18 : f32 to vector<8x16xf32>
    %50 = arith.select %48, %16, %49 : vector<8x16xi1>, vector<8x16xf32>
    %cst_19 = arith.constant dense<0x7F800000> : vector<8xf32>
    %51 = vector.multi_reduction <minimumf>, %50, %cst_19 [1] : vector<8x16xf32> to vector<8xf32>
    %52 = vector.shape_cast %51 : vector<8xf32> to vector<8x1xf32>
    %53 = vector.broadcast %52 : vector<8x1xf32> to vector<8x16xf32>
    %54 = arith.cmpf oeq, %16, %53 : vector<8x16xf32>
    %cst_20 = arith.constant 0x7F800000 : f32
    %55 = vector.broadcast %cst_20 : f32 to vector<8x16xf32>
    %56 = arith.select %54, %55, %29 : vector<8x16xi1>, vector<8x16xf32>
    %cst_21 = arith.constant dense<0x7F800000> : vector<8xf32>
    %57 = vector.multi_reduction <minimumf>, %41, %cst_21 [1] : vector<8x16xf32> to vector<8xf32>
    %58 = vector.shape_cast %57 : vector<8xf32> to vector<8x1xf32>
    %59 = vector.broadcast %58 : vector<8x1xf32> to vector<8x16xf32>
    %60 = arith.cmpf oeq, %41, %59 : vector<8x16xf32>
    %cst_22 = arith.constant 1.600000e+01 : f32
    %61 = vector.broadcast %cst_22 : f32 to vector<8x16xf32>
    %62 = arith.select %60, %16, %61 : vector<8x16xi1>, vector<8x16xf32>
    %cst_23 = arith.constant dense<0x7F800000> : vector<8xf32>
    %63 = vector.multi_reduction <minimumf>, %62, %cst_23 [1] : vector<8x16xf32> to vector<8xf32>
    %64 = vector.shape_cast %63 : vector<8xf32> to vector<8x1xf32>
    %65 = vector.broadcast %64 : vector<8x1xf32> to vector<8x16xf32>
    %66 = arith.cmpf oeq, %16, %65 : vector<8x16xf32>
    %cst_24 = arith.constant 0x7F800000 : f32
    %67 = vector.broadcast %cst_24 : f32 to vector<8x16xf32>
    %68 = arith.select %66, %67, %41 : vector<8x16xi1>, vector<8x16xf32>
    %69 = arith.subf %46, %58 : vector<8x1xf32>
    %70 = arith.mulf %69, %69 : vector<8x1xf32>
    %71 = arith.addf %44, %70 : vector<8x1xf32>
    %cst_25 = arith.constant dense<0x7F800000> : vector<8xf32>
    %72 = vector.multi_reduction <minimumf>, %56, %cst_25 [1] : vector<8x16xf32> to vector<8xf32>
    %73 = vector.shape_cast %72 : vector<8xf32> to vector<8x1xf32>
    %74 = vector.broadcast %73 : vector<8x1xf32> to vector<8x16xf32>
    %75 = arith.cmpf oeq, %56, %74 : vector<8x16xf32>
    %cst_26 = arith.constant 1.600000e+01 : f32
    %76 = vector.broadcast %cst_26 : f32 to vector<8x16xf32>
    %77 = arith.select %75, %16, %76 : vector<8x16xi1>, vector<8x16xf32>
    %cst_27 = arith.constant dense<0x7F800000> : vector<8xf32>
    %78 = vector.multi_reduction <minimumf>, %77, %cst_27 [1] : vector<8x16xf32> to vector<8xf32>
    %79 = vector.shape_cast %78 : vector<8xf32> to vector<8x1xf32>
    %80 = vector.broadcast %79 : vector<8x1xf32> to vector<8x16xf32>
    %81 = arith.cmpf oeq, %16, %80 : vector<8x16xf32>
    %cst_28 = arith.constant 0x7F800000 : f32
    %82 = vector.broadcast %cst_28 : f32 to vector<8x16xf32>
    %83 = arith.select %81, %82, %56 : vector<8x16xi1>, vector<8x16xf32>
    %cst_29 = arith.constant dense<0x7F800000> : vector<8xf32>
    %84 = vector.multi_reduction <minimumf>, %68, %cst_29 [1] : vector<8x16xf32> to vector<8xf32>
    %85 = vector.shape_cast %84 : vector<8xf32> to vector<8x1xf32>
    %86 = vector.broadcast %85 : vector<8x1xf32> to vector<8x16xf32>
    %87 = arith.cmpf oeq, %68, %86 : vector<8x16xf32>
    %cst_30 = arith.constant 1.600000e+01 : f32
    %88 = vector.broadcast %cst_30 : f32 to vector<8x16xf32>
    %89 = arith.select %87, %16, %88 : vector<8x16xi1>, vector<8x16xf32>
    %cst_31 = arith.constant dense<0x7F800000> : vector<8xf32>
    %90 = vector.multi_reduction <minimumf>, %89, %cst_31 [1] : vector<8x16xf32> to vector<8xf32>
    %91 = vector.shape_cast %90 : vector<8xf32> to vector<8x1xf32>
    %92 = vector.broadcast %91 : vector<8x1xf32> to vector<8x16xf32>
    %93 = arith.cmpf oeq, %16, %92 : vector<8x16xf32>
    %cst_32 = arith.constant 0x7F800000 : f32
    %94 = vector.broadcast %cst_32 : f32 to vector<8x16xf32>
    %95 = arith.select %93, %94, %68 : vector<8x16xi1>, vector<8x16xf32>
    %96 = arith.subf %73, %85 : vector<8x1xf32>
    %97 = arith.mulf %96, %96 : vector<8x1xf32>
    %98 = arith.addf %71, %97 : vector<8x1xf32>
    %cst_33 = arith.constant dense<0x7F800000> : vector<8xf32>
    %99 = vector.multi_reduction <minimumf>, %83, %cst_33 [1] : vector<8x16xf32> to vector<8xf32>
    %100 = vector.shape_cast %99 : vector<8xf32> to vector<8x1xf32>
    %101 = vector.broadcast %100 : vector<8x1xf32> to vector<8x16xf32>
    %102 = arith.cmpf oeq, %83, %101 : vector<8x16xf32>
    %cst_34 = arith.constant 1.600000e+01 : f32
    %103 = vector.broadcast %cst_34 : f32 to vector<8x16xf32>
    %104 = arith.select %102, %16, %103 : vector<8x16xi1>, vector<8x16xf32>
    %cst_35 = arith.constant dense<0x7F800000> : vector<8xf32>
    %105 = vector.multi_reduction <minimumf>, %104, %cst_35 [1] : vector<8x16xf32> to vector<8xf32>
    %106 = vector.shape_cast %105 : vector<8xf32> to vector<8x1xf32>
    %107 = vector.broadcast %106 : vector<8x1xf32> to vector<8x16xf32>
    %108 = arith.cmpf oeq, %16, %107 : vector<8x16xf32>
    %cst_36 = arith.constant 0x7F800000 : f32
    %109 = vector.broadcast %cst_36 : f32 to vector<8x16xf32>
    %110 = arith.select %108, %109, %83 : vector<8x16xi1>, vector<8x16xf32>
    %cst_37 = arith.constant dense<0x7F800000> : vector<8xf32>
    %111 = vector.multi_reduction <minimumf>, %95, %cst_37 [1] : vector<8x16xf32> to vector<8xf32>
    %112 = vector.shape_cast %111 : vector<8xf32> to vector<8x1xf32>
    %113 = vector.broadcast %112 : vector<8x1xf32> to vector<8x16xf32>
    %114 = arith.cmpf oeq, %95, %113 : vector<8x16xf32>
    %cst_38 = arith.constant 1.600000e+01 : f32
    %115 = vector.broadcast %cst_38 : f32 to vector<8x16xf32>
    %116 = arith.select %114, %16, %115 : vector<8x16xi1>, vector<8x16xf32>
    %cst_39 = arith.constant dense<0x7F800000> : vector<8xf32>
    %117 = vector.multi_reduction <minimumf>, %116, %cst_39 [1] : vector<8x16xf32> to vector<8xf32>
    %118 = vector.shape_cast %117 : vector<8xf32> to vector<8x1xf32>
    %119 = vector.broadcast %118 : vector<8x1xf32> to vector<8x16xf32>
    %120 = arith.cmpf oeq, %16, %119 : vector<8x16xf32>
    %cst_40 = arith.constant 0x7F800000 : f32
    %121 = vector.broadcast %cst_40 : f32 to vector<8x16xf32>
    %122 = arith.select %120, %121, %95 : vector<8x16xi1>, vector<8x16xf32>
    %123 = arith.subf %100, %112 : vector<8x1xf32>
    %124 = arith.mulf %123, %123 : vector<8x1xf32>
    %125 = arith.addf %98, %124 : vector<8x1xf32>
    %cst_41 = arith.constant dense<0x7F800000> : vector<8xf32>
    %126 = vector.multi_reduction <minimumf>, %110, %cst_41 [1] : vector<8x16xf32> to vector<8xf32>
    %127 = vector.shape_cast %126 : vector<8xf32> to vector<8x1xf32>
    %128 = vector.broadcast %127 : vector<8x1xf32> to vector<8x16xf32>
    %129 = arith.cmpf oeq, %110, %128 : vector<8x16xf32>
    %cst_42 = arith.constant 1.600000e+01 : f32
    %130 = vector.broadcast %cst_42 : f32 to vector<8x16xf32>
    %131 = arith.select %129, %16, %130 : vector<8x16xi1>, vector<8x16xf32>
    %cst_43 = arith.constant dense<0x7F800000> : vector<8xf32>
    %132 = vector.multi_reduction <minimumf>, %131, %cst_43 [1] : vector<8x16xf32> to vector<8xf32>
    %133 = vector.shape_cast %132 : vector<8xf32> to vector<8x1xf32>
    %134 = vector.broadcast %133 : vector<8x1xf32> to vector<8x16xf32>
    %135 = arith.cmpf oeq, %16, %134 : vector<8x16xf32>
    %cst_44 = arith.constant 0x7F800000 : f32
    %136 = vector.broadcast %cst_44 : f32 to vector<8x16xf32>
    %137 = arith.select %135, %136, %110 : vector<8x16xi1>, vector<8x16xf32>
    %cst_45 = arith.constant dense<0x7F800000> : vector<8xf32>
    %138 = vector.multi_reduction <minimumf>, %122, %cst_45 [1] : vector<8x16xf32> to vector<8xf32>
    %139 = vector.shape_cast %138 : vector<8xf32> to vector<8x1xf32>
    %140 = vector.broadcast %139 : vector<8x1xf32> to vector<8x16xf32>
    %141 = arith.cmpf oeq, %122, %140 : vector<8x16xf32>
    %cst_46 = arith.constant 1.600000e+01 : f32
    %142 = vector.broadcast %cst_46 : f32 to vector<8x16xf32>
    %143 = arith.select %141, %16, %142 : vector<8x16xi1>, vector<8x16xf32>
    %cst_47 = arith.constant dense<0x7F800000> : vector<8xf32>
    %144 = vector.multi_reduction <minimumf>, %143, %cst_47 [1] : vector<8x16xf32> to vector<8xf32>
    %145 = vector.shape_cast %144 : vector<8xf32> to vector<8x1xf32>
    %146 = vector.broadcast %145 : vector<8x1xf32> to vector<8x16xf32>
    %147 = arith.cmpf oeq, %16, %146 : vector<8x16xf32>
    %cst_48 = arith.constant 0x7F800000 : f32
    %148 = vector.broadcast %cst_48 : f32 to vector<8x16xf32>
    %149 = arith.select %147, %148, %122 : vector<8x16xi1>, vector<8x16xf32>
    %150 = arith.subf %127, %139 : vector<8x1xf32>
    %151 = arith.mulf %150, %150 : vector<8x1xf32>
    %152 = arith.addf %125, %151 : vector<8x1xf32>
    %cst_49 = arith.constant dense<0x7F800000> : vector<8xf32>
    %153 = vector.multi_reduction <minimumf>, %137, %cst_49 [1] : vector<8x16xf32> to vector<8xf32>
    %154 = vector.shape_cast %153 : vector<8xf32> to vector<8x1xf32>
    %155 = vector.broadcast %154 : vector<8x1xf32> to vector<8x16xf32>
    %156 = arith.cmpf oeq, %137, %155 : vector<8x16xf32>
    %cst_50 = arith.constant 1.600000e+01 : f32
    %157 = vector.broadcast %cst_50 : f32 to vector<8x16xf32>
    %158 = arith.select %156, %16, %157 : vector<8x16xi1>, vector<8x16xf32>
    %cst_51 = arith.constant dense<0x7F800000> : vector<8xf32>
    %159 = vector.multi_reduction <minimumf>, %158, %cst_51 [1] : vector<8x16xf32> to vector<8xf32>
    %160 = vector.shape_cast %159 : vector<8xf32> to vector<8x1xf32>
    %161 = vector.broadcast %160 : vector<8x1xf32> to vector<8x16xf32>
    %162 = arith.cmpf oeq, %16, %161 : vector<8x16xf32>
    %cst_52 = arith.constant 0x7F800000 : f32
    %163 = vector.broadcast %cst_52 : f32 to vector<8x16xf32>
    %164 = arith.select %162, %163, %137 : vector<8x16xi1>, vector<8x16xf32>
    %cst_53 = arith.constant dense<0x7F800000> : vector<8xf32>
    %165 = vector.multi_reduction <minimumf>, %149, %cst_53 [1] : vector<8x16xf32> to vector<8xf32>
    %166 = vector.shape_cast %165 : vector<8xf32> to vector<8x1xf32>
    %167 = vector.broadcast %166 : vector<8x1xf32> to vector<8x16xf32>
    %168 = arith.cmpf oeq, %149, %167 : vector<8x16xf32>
    %cst_54 = arith.constant 1.600000e+01 : f32
    %169 = vector.broadcast %cst_54 : f32 to vector<8x16xf32>
    %170 = arith.select %168, %16, %169 : vector<8x16xi1>, vector<8x16xf32>
    %cst_55 = arith.constant dense<0x7F800000> : vector<8xf32>
    %171 = vector.multi_reduction <minimumf>, %170, %cst_55 [1] : vector<8x16xf32> to vector<8xf32>
    %172 = vector.shape_cast %171 : vector<8xf32> to vector<8x1xf32>
    %173 = vector.broadcast %172 : vector<8x1xf32> to vector<8x16xf32>
    %174 = arith.cmpf oeq, %16, %173 : vector<8x16xf32>
    %cst_56 = arith.constant 0x7F800000 : f32
    %175 = vector.broadcast %cst_56 : f32 to vector<8x16xf32>
    %176 = arith.select %174, %175, %149 : vector<8x16xi1>, vector<8x16xf32>
    %177 = arith.subf %154, %166 : vector<8x1xf32>
    %178 = arith.mulf %177, %177 : vector<8x1xf32>
    %179 = arith.addf %152, %178 : vector<8x1xf32>
    %cst_57 = arith.constant dense<0x7F800000> : vector<8xf32>
    %180 = vector.multi_reduction <minimumf>, %164, %cst_57 [1] : vector<8x16xf32> to vector<8xf32>
    %181 = vector.shape_cast %180 : vector<8xf32> to vector<8x1xf32>
    %182 = vector.broadcast %181 : vector<8x1xf32> to vector<8x16xf32>
    %183 = arith.cmpf oeq, %164, %182 : vector<8x16xf32>
    %cst_58 = arith.constant 1.600000e+01 : f32
    %184 = vector.broadcast %cst_58 : f32 to vector<8x16xf32>
    %185 = arith.select %183, %16, %184 : vector<8x16xi1>, vector<8x16xf32>
    %cst_59 = arith.constant dense<0x7F800000> : vector<8xf32>
    %186 = vector.multi_reduction <minimumf>, %185, %cst_59 [1] : vector<8x16xf32> to vector<8xf32>
    %187 = vector.shape_cast %186 : vector<8xf32> to vector<8x1xf32>
    %188 = vector.broadcast %187 : vector<8x1xf32> to vector<8x16xf32>
    %189 = arith.cmpf oeq, %16, %188 : vector<8x16xf32>
    %cst_60 = arith.constant 0x7F800000 : f32
    %190 = vector.broadcast %cst_60 : f32 to vector<8x16xf32>
    %191 = arith.select %189, %190, %164 : vector<8x16xi1>, vector<8x16xf32>
    %cst_61 = arith.constant dense<0x7F800000> : vector<8xf32>
    %192 = vector.multi_reduction <minimumf>, %176, %cst_61 [1] : vector<8x16xf32> to vector<8xf32>
    %193 = vector.shape_cast %192 : vector<8xf32> to vector<8x1xf32>
    %194 = vector.broadcast %193 : vector<8x1xf32> to vector<8x16xf32>
    %195 = arith.cmpf oeq, %176, %194 : vector<8x16xf32>
    %cst_62 = arith.constant 1.600000e+01 : f32
    %196 = vector.broadcast %cst_62 : f32 to vector<8x16xf32>
    %197 = arith.select %195, %16, %196 : vector<8x16xi1>, vector<8x16xf32>
    %cst_63 = arith.constant dense<0x7F800000> : vector<8xf32>
    %198 = vector.multi_reduction <minimumf>, %197, %cst_63 [1] : vector<8x16xf32> to vector<8xf32>
    %199 = vector.shape_cast %198 : vector<8xf32> to vector<8x1xf32>
    %200 = vector.broadcast %199 : vector<8x1xf32> to vector<8x16xf32>
    %201 = arith.cmpf oeq, %16, %200 : vector<8x16xf32>
    %cst_64 = arith.constant 0x7F800000 : f32
    %202 = vector.broadcast %cst_64 : f32 to vector<8x16xf32>
    %203 = arith.select %201, %202, %176 : vector<8x16xi1>, vector<8x16xf32>
    %204 = arith.subf %181, %193 : vector<8x1xf32>
    %205 = arith.mulf %204, %204 : vector<8x1xf32>
    %206 = arith.addf %179, %205 : vector<8x1xf32>
    %cst_65 = arith.constant dense<0x7F800000> : vector<8xf32>
    %207 = vector.multi_reduction <minimumf>, %191, %cst_65 [1] : vector<8x16xf32> to vector<8xf32>
    %208 = vector.shape_cast %207 : vector<8xf32> to vector<8x1xf32>
    %209 = vector.broadcast %208 : vector<8x1xf32> to vector<8x16xf32>
    %210 = arith.cmpf oeq, %191, %209 : vector<8x16xf32>
    %cst_66 = arith.constant 1.600000e+01 : f32
    %211 = vector.broadcast %cst_66 : f32 to vector<8x16xf32>
    %212 = arith.select %210, %16, %211 : vector<8x16xi1>, vector<8x16xf32>
    %cst_67 = arith.constant dense<0x7F800000> : vector<8xf32>
    %213 = vector.multi_reduction <minimumf>, %212, %cst_67 [1] : vector<8x16xf32> to vector<8xf32>
    %214 = vector.shape_cast %213 : vector<8xf32> to vector<8x1xf32>
    %215 = vector.broadcast %214 : vector<8x1xf32> to vector<8x16xf32>
    %216 = arith.cmpf oeq, %16, %215 : vector<8x16xf32>
    %cst_68 = arith.constant 0x7F800000 : f32
    %217 = vector.broadcast %cst_68 : f32 to vector<8x16xf32>
    %218 = arith.select %216, %217, %191 : vector<8x16xi1>, vector<8x16xf32>
    %cst_69 = arith.constant dense<0x7F800000> : vector<8xf32>
    %219 = vector.multi_reduction <minimumf>, %203, %cst_69 [1] : vector<8x16xf32> to vector<8xf32>
    %220 = vector.shape_cast %219 : vector<8xf32> to vector<8x1xf32>
    %221 = vector.broadcast %220 : vector<8x1xf32> to vector<8x16xf32>
    %222 = arith.cmpf oeq, %203, %221 : vector<8x16xf32>
    %cst_70 = arith.constant 1.600000e+01 : f32
    %223 = vector.broadcast %cst_70 : f32 to vector<8x16xf32>
    %224 = arith.select %222, %16, %223 : vector<8x16xi1>, vector<8x16xf32>
    %cst_71 = arith.constant dense<0x7F800000> : vector<8xf32>
    %225 = vector.multi_reduction <minimumf>, %224, %cst_71 [1] : vector<8x16xf32> to vector<8xf32>
    %226 = vector.shape_cast %225 : vector<8xf32> to vector<8x1xf32>
    %227 = vector.broadcast %226 : vector<8x1xf32> to vector<8x16xf32>
    %228 = arith.cmpf oeq, %16, %227 : vector<8x16xf32>
    %cst_72 = arith.constant 0x7F800000 : f32
    %229 = vector.broadcast %cst_72 : f32 to vector<8x16xf32>
    %230 = arith.select %228, %229, %203 : vector<8x16xi1>, vector<8x16xf32>
    %231 = arith.subf %208, %220 : vector<8x1xf32>
    %232 = arith.mulf %231, %231 : vector<8x1xf32>
    %233 = arith.addf %206, %232 : vector<8x1xf32>
    %cst_73 = arith.constant dense<0x7F800000> : vector<8xf32>
    %234 = vector.multi_reduction <minimumf>, %218, %cst_73 [1] : vector<8x16xf32> to vector<8xf32>
    %235 = vector.shape_cast %234 : vector<8xf32> to vector<8x1xf32>
    %236 = vector.broadcast %235 : vector<8x1xf32> to vector<8x16xf32>
    %237 = arith.cmpf oeq, %218, %236 : vector<8x16xf32>
    %cst_74 = arith.constant 1.600000e+01 : f32
    %238 = vector.broadcast %cst_74 : f32 to vector<8x16xf32>
    %239 = arith.select %237, %16, %238 : vector<8x16xi1>, vector<8x16xf32>
    %cst_75 = arith.constant dense<0x7F800000> : vector<8xf32>
    %240 = vector.multi_reduction <minimumf>, %239, %cst_75 [1] : vector<8x16xf32> to vector<8xf32>
    %241 = vector.shape_cast %240 : vector<8xf32> to vector<8x1xf32>
    %242 = vector.broadcast %241 : vector<8x1xf32> to vector<8x16xf32>
    %243 = arith.cmpf oeq, %16, %242 : vector<8x16xf32>
    %cst_76 = arith.constant 0x7F800000 : f32
    %244 = vector.broadcast %cst_76 : f32 to vector<8x16xf32>
    %245 = arith.select %243, %244, %218 : vector<8x16xi1>, vector<8x16xf32>
    %cst_77 = arith.constant dense<0x7F800000> : vector<8xf32>
    %246 = vector.multi_reduction <minimumf>, %230, %cst_77 [1] : vector<8x16xf32> to vector<8xf32>
    %247 = vector.shape_cast %246 : vector<8xf32> to vector<8x1xf32>
    %248 = vector.broadcast %247 : vector<8x1xf32> to vector<8x16xf32>
    %249 = arith.cmpf oeq, %230, %248 : vector<8x16xf32>
    %cst_78 = arith.constant 1.600000e+01 : f32
    %250 = vector.broadcast %cst_78 : f32 to vector<8x16xf32>
    %251 = arith.select %249, %16, %250 : vector<8x16xi1>, vector<8x16xf32>
    %cst_79 = arith.constant dense<0x7F800000> : vector<8xf32>
    %252 = vector.multi_reduction <minimumf>, %251, %cst_79 [1] : vector<8x16xf32> to vector<8xf32>
    %253 = vector.shape_cast %252 : vector<8xf32> to vector<8x1xf32>
    %254 = vector.broadcast %253 : vector<8x1xf32> to vector<8x16xf32>
    %255 = arith.cmpf oeq, %16, %254 : vector<8x16xf32>
    %cst_80 = arith.constant 0x7F800000 : f32
    %256 = vector.broadcast %cst_80 : f32 to vector<8x16xf32>
    %257 = arith.select %255, %256, %230 : vector<8x16xi1>, vector<8x16xf32>
    %258 = arith.subf %235, %247 : vector<8x1xf32>
    %259 = arith.mulf %258, %258 : vector<8x1xf32>
    %260 = arith.addf %233, %259 : vector<8x1xf32>
    %cst_81 = arith.constant dense<0x7F800000> : vector<8xf32>
    %261 = vector.multi_reduction <minimumf>, %245, %cst_81 [1] : vector<8x16xf32> to vector<8xf32>
    %262 = vector.shape_cast %261 : vector<8xf32> to vector<8x1xf32>
    %263 = vector.broadcast %262 : vector<8x1xf32> to vector<8x16xf32>
    %264 = arith.cmpf oeq, %245, %263 : vector<8x16xf32>
    %cst_82 = arith.constant 1.600000e+01 : f32
    %265 = vector.broadcast %cst_82 : f32 to vector<8x16xf32>
    %266 = arith.select %264, %16, %265 : vector<8x16xi1>, vector<8x16xf32>
    %cst_83 = arith.constant dense<0x7F800000> : vector<8xf32>
    %267 = vector.multi_reduction <minimumf>, %266, %cst_83 [1] : vector<8x16xf32> to vector<8xf32>
    %268 = vector.shape_cast %267 : vector<8xf32> to vector<8x1xf32>
    %269 = vector.broadcast %268 : vector<8x1xf32> to vector<8x16xf32>
    %270 = arith.cmpf oeq, %16, %269 : vector<8x16xf32>
    %cst_84 = arith.constant 0x7F800000 : f32
    %271 = vector.broadcast %cst_84 : f32 to vector<8x16xf32>
    %272 = arith.select %270, %271, %245 : vector<8x16xi1>, vector<8x16xf32>
    %cst_85 = arith.constant dense<0x7F800000> : vector<8xf32>
    %273 = vector.multi_reduction <minimumf>, %257, %cst_85 [1] : vector<8x16xf32> to vector<8xf32>
    %274 = vector.shape_cast %273 : vector<8xf32> to vector<8x1xf32>
    %275 = vector.broadcast %274 : vector<8x1xf32> to vector<8x16xf32>
    %276 = arith.cmpf oeq, %257, %275 : vector<8x16xf32>
    %cst_86 = arith.constant 1.600000e+01 : f32
    %277 = vector.broadcast %cst_86 : f32 to vector<8x16xf32>
    %278 = arith.select %276, %16, %277 : vector<8x16xi1>, vector<8x16xf32>
    %cst_87 = arith.constant dense<0x7F800000> : vector<8xf32>
    %279 = vector.multi_reduction <minimumf>, %278, %cst_87 [1] : vector<8x16xf32> to vector<8xf32>
    %280 = vector.shape_cast %279 : vector<8xf32> to vector<8x1xf32>
    %281 = vector.broadcast %280 : vector<8x1xf32> to vector<8x16xf32>
    %282 = arith.cmpf oeq, %16, %281 : vector<8x16xf32>
    %cst_88 = arith.constant 0x7F800000 : f32
    %283 = vector.broadcast %cst_88 : f32 to vector<8x16xf32>
    %284 = arith.select %282, %283, %257 : vector<8x16xi1>, vector<8x16xf32>
    %285 = arith.subf %262, %274 : vector<8x1xf32>
    %286 = arith.mulf %285, %285 : vector<8x1xf32>
    %287 = arith.addf %260, %286 : vector<8x1xf32>
    %cst_89 = arith.constant dense<0x7F800000> : vector<8xf32>
    %288 = vector.multi_reduction <minimumf>, %272, %cst_89 [1] : vector<8x16xf32> to vector<8xf32>
    %289 = vector.shape_cast %288 : vector<8xf32> to vector<8x1xf32>
    %290 = vector.broadcast %289 : vector<8x1xf32> to vector<8x16xf32>
    %291 = arith.cmpf oeq, %272, %290 : vector<8x16xf32>
    %cst_90 = arith.constant 1.600000e+01 : f32
    %292 = vector.broadcast %cst_90 : f32 to vector<8x16xf32>
    %293 = arith.select %291, %16, %292 : vector<8x16xi1>, vector<8x16xf32>
    %cst_91 = arith.constant dense<0x7F800000> : vector<8xf32>
    %294 = vector.multi_reduction <minimumf>, %293, %cst_91 [1] : vector<8x16xf32> to vector<8xf32>
    %295 = vector.shape_cast %294 : vector<8xf32> to vector<8x1xf32>
    %296 = vector.broadcast %295 : vector<8x1xf32> to vector<8x16xf32>
    %297 = arith.cmpf oeq, %16, %296 : vector<8x16xf32>
    %cst_92 = arith.constant 0x7F800000 : f32
    %298 = vector.broadcast %cst_92 : f32 to vector<8x16xf32>
    %299 = arith.select %297, %298, %272 : vector<8x16xi1>, vector<8x16xf32>
    %cst_93 = arith.constant dense<0x7F800000> : vector<8xf32>
    %300 = vector.multi_reduction <minimumf>, %284, %cst_93 [1] : vector<8x16xf32> to vector<8xf32>
    %301 = vector.shape_cast %300 : vector<8xf32> to vector<8x1xf32>
    %302 = vector.broadcast %301 : vector<8x1xf32> to vector<8x16xf32>
    %303 = arith.cmpf oeq, %284, %302 : vector<8x16xf32>
    %cst_94 = arith.constant 1.600000e+01 : f32
    %304 = vector.broadcast %cst_94 : f32 to vector<8x16xf32>
    %305 = arith.select %303, %16, %304 : vector<8x16xi1>, vector<8x16xf32>
    %cst_95 = arith.constant dense<0x7F800000> : vector<8xf32>
    %306 = vector.multi_reduction <minimumf>, %305, %cst_95 [1] : vector<8x16xf32> to vector<8xf32>
    %307 = vector.shape_cast %306 : vector<8xf32> to vector<8x1xf32>
    %308 = vector.broadcast %307 : vector<8x1xf32> to vector<8x16xf32>
    %309 = arith.cmpf oeq, %16, %308 : vector<8x16xf32>
    %cst_96 = arith.constant 0x7F800000 : f32
    %310 = vector.broadcast %cst_96 : f32 to vector<8x16xf32>
    %311 = arith.select %309, %310, %284 : vector<8x16xi1>, vector<8x16xf32>
    %312 = arith.subf %289, %301 : vector<8x1xf32>
    %313 = arith.mulf %312, %312 : vector<8x1xf32>
    %314 = arith.addf %287, %313 : vector<8x1xf32>
    %cst_97 = arith.constant dense<0x7F800000> : vector<8xf32>
    %315 = vector.multi_reduction <minimumf>, %299, %cst_97 [1] : vector<8x16xf32> to vector<8xf32>
    %316 = vector.shape_cast %315 : vector<8xf32> to vector<8x1xf32>
    %317 = vector.broadcast %316 : vector<8x1xf32> to vector<8x16xf32>
    %318 = arith.cmpf oeq, %299, %317 : vector<8x16xf32>
    %cst_98 = arith.constant 1.600000e+01 : f32
    %319 = vector.broadcast %cst_98 : f32 to vector<8x16xf32>
    %320 = arith.select %318, %16, %319 : vector<8x16xi1>, vector<8x16xf32>
    %cst_99 = arith.constant dense<0x7F800000> : vector<8xf32>
    %321 = vector.multi_reduction <minimumf>, %320, %cst_99 [1] : vector<8x16xf32> to vector<8xf32>
    %322 = vector.shape_cast %321 : vector<8xf32> to vector<8x1xf32>
    %323 = vector.broadcast %322 : vector<8x1xf32> to vector<8x16xf32>
    %324 = arith.cmpf oeq, %16, %323 : vector<8x16xf32>
    %cst_100 = arith.constant 0x7F800000 : f32
    %325 = vector.broadcast %cst_100 : f32 to vector<8x16xf32>
    %326 = arith.select %324, %325, %299 : vector<8x16xi1>, vector<8x16xf32>
    %cst_101 = arith.constant dense<0x7F800000> : vector<8xf32>
    %327 = vector.multi_reduction <minimumf>, %311, %cst_101 [1] : vector<8x16xf32> to vector<8xf32>
    %328 = vector.shape_cast %327 : vector<8xf32> to vector<8x1xf32>
    %329 = vector.broadcast %328 : vector<8x1xf32> to vector<8x16xf32>
    %330 = arith.cmpf oeq, %311, %329 : vector<8x16xf32>
    %cst_102 = arith.constant 1.600000e+01 : f32
    %331 = vector.broadcast %cst_102 : f32 to vector<8x16xf32>
    %332 = arith.select %330, %16, %331 : vector<8x16xi1>, vector<8x16xf32>
    %cst_103 = arith.constant dense<0x7F800000> : vector<8xf32>
    %333 = vector.multi_reduction <minimumf>, %332, %cst_103 [1] : vector<8x16xf32> to vector<8xf32>
    %334 = vector.shape_cast %333 : vector<8xf32> to vector<8x1xf32>
    %335 = vector.broadcast %334 : vector<8x1xf32> to vector<8x16xf32>
    %336 = arith.cmpf oeq, %16, %335 : vector<8x16xf32>
    %cst_104 = arith.constant 0x7F800000 : f32
    %337 = vector.broadcast %cst_104 : f32 to vector<8x16xf32>
    %338 = arith.select %336, %337, %311 : vector<8x16xi1>, vector<8x16xf32>
    %339 = arith.subf %316, %328 : vector<8x1xf32>
    %340 = arith.mulf %339, %339 : vector<8x1xf32>
    %341 = arith.addf %314, %340 : vector<8x1xf32>
    %cst_105 = arith.constant dense<0x7F800000> : vector<8xf32>
    %342 = vector.multi_reduction <minimumf>, %326, %cst_105 [1] : vector<8x16xf32> to vector<8xf32>
    %343 = vector.shape_cast %342 : vector<8xf32> to vector<8x1xf32>
    %344 = vector.broadcast %343 : vector<8x1xf32> to vector<8x16xf32>
    %345 = arith.cmpf oeq, %326, %344 : vector<8x16xf32>
    %cst_106 = arith.constant 1.600000e+01 : f32
    %346 = vector.broadcast %cst_106 : f32 to vector<8x16xf32>
    %347 = arith.select %345, %16, %346 : vector<8x16xi1>, vector<8x16xf32>
    %cst_107 = arith.constant dense<0x7F800000> : vector<8xf32>
    %348 = vector.multi_reduction <minimumf>, %347, %cst_107 [1] : vector<8x16xf32> to vector<8xf32>
    %349 = vector.shape_cast %348 : vector<8xf32> to vector<8x1xf32>
    %350 = vector.broadcast %349 : vector<8x1xf32> to vector<8x16xf32>
    %351 = arith.cmpf oeq, %16, %350 : vector<8x16xf32>
    %cst_108 = arith.constant 0x7F800000 : f32
    %352 = vector.broadcast %cst_108 : f32 to vector<8x16xf32>
    %353 = arith.select %351, %352, %326 : vector<8x16xi1>, vector<8x16xf32>
    %cst_109 = arith.constant dense<0x7F800000> : vector<8xf32>
    %354 = vector.multi_reduction <minimumf>, %338, %cst_109 [1] : vector<8x16xf32> to vector<8xf32>
    %355 = vector.shape_cast %354 : vector<8xf32> to vector<8x1xf32>
    %356 = vector.broadcast %355 : vector<8x1xf32> to vector<8x16xf32>
    %357 = arith.cmpf oeq, %338, %356 : vector<8x16xf32>
    %cst_110 = arith.constant 1.600000e+01 : f32
    %358 = vector.broadcast %cst_110 : f32 to vector<8x16xf32>
    %359 = arith.select %357, %16, %358 : vector<8x16xi1>, vector<8x16xf32>
    %cst_111 = arith.constant dense<0x7F800000> : vector<8xf32>
    %360 = vector.multi_reduction <minimumf>, %359, %cst_111 [1] : vector<8x16xf32> to vector<8xf32>
    %361 = vector.shape_cast %360 : vector<8xf32> to vector<8x1xf32>
    %362 = vector.broadcast %361 : vector<8x1xf32> to vector<8x16xf32>
    %363 = arith.cmpf oeq, %16, %362 : vector<8x16xf32>
    %cst_112 = arith.constant 0x7F800000 : f32
    %364 = vector.broadcast %cst_112 : f32 to vector<8x16xf32>
    %365 = arith.select %363, %364, %338 : vector<8x16xi1>, vector<8x16xf32>
    %366 = arith.subf %343, %355 : vector<8x1xf32>
    %367 = arith.mulf %366, %366 : vector<8x1xf32>
    %368 = arith.addf %341, %367 : vector<8x1xf32>
    %cst_113 = arith.constant dense<0x7F800000> : vector<8xf32>
    %369 = vector.multi_reduction <minimumf>, %353, %cst_113 [1] : vector<8x16xf32> to vector<8xf32>
    %370 = vector.shape_cast %369 : vector<8xf32> to vector<8x1xf32>
    %371 = vector.broadcast %370 : vector<8x1xf32> to vector<8x16xf32>
    %372 = arith.cmpf oeq, %353, %371 : vector<8x16xf32>
    %cst_114 = arith.constant 1.600000e+01 : f32
    %373 = vector.broadcast %cst_114 : f32 to vector<8x16xf32>
    %374 = arith.select %372, %16, %373 : vector<8x16xi1>, vector<8x16xf32>
    %cst_115 = arith.constant dense<0x7F800000> : vector<8xf32>
    %375 = vector.multi_reduction <minimumf>, %374, %cst_115 [1] : vector<8x16xf32> to vector<8xf32>
    %376 = vector.shape_cast %375 : vector<8xf32> to vector<8x1xf32>
    %377 = vector.broadcast %376 : vector<8x1xf32> to vector<8x16xf32>
    %378 = arith.cmpf oeq, %16, %377 : vector<8x16xf32>
    %cst_116 = arith.constant 0x7F800000 : f32
    %379 = vector.broadcast %cst_116 : f32 to vector<8x16xf32>
    %380 = arith.select %378, %379, %353 : vector<8x16xi1>, vector<8x16xf32>
    %cst_117 = arith.constant dense<0x7F800000> : vector<8xf32>
    %381 = vector.multi_reduction <minimumf>, %365, %cst_117 [1] : vector<8x16xf32> to vector<8xf32>
    %382 = vector.shape_cast %381 : vector<8xf32> to vector<8x1xf32>
    %383 = vector.broadcast %382 : vector<8x1xf32> to vector<8x16xf32>
    %384 = arith.cmpf oeq, %365, %383 : vector<8x16xf32>
    %cst_118 = arith.constant 1.600000e+01 : f32
    %385 = vector.broadcast %cst_118 : f32 to vector<8x16xf32>
    %386 = arith.select %384, %16, %385 : vector<8x16xi1>, vector<8x16xf32>
    %cst_119 = arith.constant dense<0x7F800000> : vector<8xf32>
    %387 = vector.multi_reduction <minimumf>, %386, %cst_119 [1] : vector<8x16xf32> to vector<8xf32>
    %388 = vector.shape_cast %387 : vector<8xf32> to vector<8x1xf32>
    %389 = vector.broadcast %388 : vector<8x1xf32> to vector<8x16xf32>
    %390 = arith.cmpf oeq, %16, %389 : vector<8x16xf32>
    %cst_120 = arith.constant 0x7F800000 : f32
    %391 = vector.broadcast %cst_120 : f32 to vector<8x16xf32>
    %392 = arith.select %390, %391, %365 : vector<8x16xi1>, vector<8x16xf32>
    %393 = arith.subf %370, %382 : vector<8x1xf32>
    %394 = arith.mulf %393, %393 : vector<8x1xf32>
    %395 = arith.addf %368, %394 : vector<8x1xf32>
    %cst_121 = arith.constant dense<0x7F800000> : vector<8xf32>
    %396 = vector.multi_reduction <minimumf>, %380, %cst_121 [1] : vector<8x16xf32> to vector<8xf32>
    %397 = vector.shape_cast %396 : vector<8xf32> to vector<8x1xf32>
    %398 = vector.broadcast %397 : vector<8x1xf32> to vector<8x16xf32>
    %399 = arith.cmpf oeq, %380, %398 : vector<8x16xf32>
    %cst_122 = arith.constant 1.600000e+01 : f32
    %400 = vector.broadcast %cst_122 : f32 to vector<8x16xf32>
    %401 = arith.select %399, %16, %400 : vector<8x16xi1>, vector<8x16xf32>
    %cst_123 = arith.constant dense<0x7F800000> : vector<8xf32>
    %402 = vector.multi_reduction <minimumf>, %401, %cst_123 [1] : vector<8x16xf32> to vector<8xf32>
    %403 = vector.shape_cast %402 : vector<8xf32> to vector<8x1xf32>
    %404 = vector.broadcast %403 : vector<8x1xf32> to vector<8x16xf32>
    %405 = arith.cmpf oeq, %16, %404 : vector<8x16xf32>
    %cst_124 = arith.constant 0x7F800000 : f32
    %406 = vector.broadcast %cst_124 : f32 to vector<8x16xf32>
    %407 = arith.select %405, %406, %380 : vector<8x16xi1>, vector<8x16xf32>
    %cst_125 = arith.constant dense<0x7F800000> : vector<8xf32>
    %408 = vector.multi_reduction <minimumf>, %392, %cst_125 [1] : vector<8x16xf32> to vector<8xf32>
    %409 = vector.shape_cast %408 : vector<8xf32> to vector<8x1xf32>
    %410 = vector.broadcast %409 : vector<8x1xf32> to vector<8x16xf32>
    %411 = arith.cmpf oeq, %392, %410 : vector<8x16xf32>
    %cst_126 = arith.constant 1.600000e+01 : f32
    %412 = vector.broadcast %cst_126 : f32 to vector<8x16xf32>
    %413 = arith.select %411, %16, %412 : vector<8x16xi1>, vector<8x16xf32>
    %cst_127 = arith.constant dense<0x7F800000> : vector<8xf32>
    %414 = vector.multi_reduction <minimumf>, %413, %cst_127 [1] : vector<8x16xf32> to vector<8xf32>
    %415 = vector.shape_cast %414 : vector<8xf32> to vector<8x1xf32>
    %416 = vector.broadcast %415 : vector<8x1xf32> to vector<8x16xf32>
    %417 = arith.cmpf oeq, %16, %416 : vector<8x16xf32>
    %cst_128 = arith.constant 0x7F800000 : f32
    %418 = vector.broadcast %cst_128 : f32 to vector<8x16xf32>
    %419 = arith.select %417, %418, %392 : vector<8x16xi1>, vector<8x16xf32>
    %420 = arith.subf %397, %409 : vector<8x1xf32>
    %421 = arith.mulf %420, %420 : vector<8x1xf32>
    %422 = arith.addf %395, %421 : vector<8x1xf32>
    %cst_129 = arith.constant dense<0x7F800000> : vector<8xf32>
    %423 = vector.multi_reduction <minimumf>, %407, %cst_129 [1] : vector<8x16xf32> to vector<8xf32>
    %424 = vector.shape_cast %423 : vector<8xf32> to vector<8x1xf32>
    %cst_130 = arith.constant dense<0x7F800000> : vector<8xf32>
    %425 = vector.multi_reduction <minimumf>, %419, %cst_130 [1] : vector<8x16xf32> to vector<8xf32>
    %426 = vector.shape_cast %425 : vector<8xf32> to vector<8x1xf32>
    %427 = arith.subf %424, %426 : vector<8x1xf32>
    %428 = arith.mulf %427, %427 : vector<8x1xf32>
    %429 = arith.addf %422, %428 : vector<8x1xf32>
    %430 = vector.shape_cast %429 : vector<8x1xf32> to vector<1x8x1xf32>
    %cst_131 = arith.constant dense<0.000000e+00> : vector<1xf32>
    %431 = vector.multi_reduction <add>, %430, %cst_131 [1, 2] : vector<1x8x1xf32> to vector<1xf32>
    %432 = vector.shape_cast %431 : vector<1xf32> to vector<1x1x1xf32>
    %433 = vector.extract %432[0, 0, 0] : f32 from vector<1x1x1xf32>
    %cst_132 = arith.constant 7.812500e-03 : f32
    %434 = arith.mulf %433, %cst_132 : f32
    %c0_133 = arith.constant 0 : index
    %c0_134 = arith.constant 0 : index
    %435 = memref.load %arg4[%c0_133, %c0_134] : memref<1x1xf32, #tpu.memory_space<smem>>
    memref.store %434, %arg4[%c0_133, %c0_134] : memref<1x1xf32, #tpu.memory_space<smem>>
    return
  }
  func.func @transform_0(%arg0: i32) -> (i32, i32) {
    %c0_i32 = arith.constant 0 : i32
    %c0_i32_0 = arith.constant 0 : i32
    %c0_i32_1 = arith.constant 0 : i32
    return %c0_i32, %c0_i32_0 : i32, i32
  }
  func.func @transform_1(%arg0: i32) -> (i32, i32) {
    %c0_i32 = arith.constant 0 : i32
    %c0_i32_0 = arith.constant 0 : i32
    %c0_i32_1 = arith.constant 0 : i32
    return %c0_i32, %c0_i32_0 : i32, i32
  }
  func.func @transform_2(%arg0: i32) -> (i32, i32) {
    %c0_i32 = arith.constant 0 : i32
    %c0_i32_0 = arith.constant 0 : i32
    %c0_i32_1 = arith.constant 0 : i32
    return %c0_i32, %c0_i32_0 : i32, i32
  }
  func.func @transform_3(%arg0: i32) -> (i32, i32) {
    %c0_i32 = arith.constant 0 : i32
    %c0_i32_0 = arith.constant 0 : i32
    %c0_i32_1 = arith.constant 0 : i32
    return %c0_i32, %c0_i32_0 : i32, i32
  }
}

</mosaic_0001>

<bundles_post_ra>
// kernel: tpu_custom_call.1
= control target key start
LH: loop header
LB: loop body
LE: loop exit
PB: predicated region body
PF: predicated region fallthrough
CT: control target
= control target key end

     0   :  { %vm23_vm0 = vcmask 130048   ;;  %s775_s0 = inlined_call_operand.vmem [shape: f32[8,32], index: 0, kind: input, shape index: {}]   ;;  %s776_s1 = inlined_call_operand.vmem [shape: f32[8,32], index: 1, kind: input, shape index: {}]   ;;  %s777_s2 = inlined_call_operand.vmem [shape: f32[32,16], index: 2, kind: input, shape index: {}]   ;;  %s778_s3 = inlined_call_operand.hbm [shape: f32[1,1], index: 3, kind: output, shape index: {}]  }
   0x1   :  { %v18_v0 = vld [vmem:[%s777_s2 + $0x18] sm:$0xff]  ;;  %v17_v1 = vld [vmem:[%s777_s2 + $0x10] sm:$0xff]  ;;  %v16_v2 = vld [vmem:[%s777_s2 + $0x8] sm:$0xff] }
   0x2   :  { %65 = vmatpush.msra.mxu0 %v18_v0  ;;  %v21_v3 = vmul.f32 %v17_v1, %v17_v1  ;;  %v20_v4 = vmul.f32 %v16_v2, %v16_v2  ;;  %v15_v5 = vld [vmem:[%s777_s2] sm:$0xff]  ;;  %90 = vmatpush.msra.mxu1 %v18_v0  ;;  %v22_v6 = vmul.f32 %v18_v0, %v18_v0 }
   0x3   :  { %v19_v7 = vmul.f32 %v15_v5, %v15_v5 }
   0x4   :  { %8 = vsyncpa [#allocation3], 0  ;;  %66 = vmatpush.msra.mxu0 %v17_v1  ;;  %v25_v8 = vsel %vm23_vm0, %v20_v4, 0.0  ;;  %91 = vmatpush.msra.mxu1 %v17_v1  ;;  %v27_v9 = vsel %vm23_vm0, %v21_v3, 0.0  ;;  %v48_v12 = vld [vmem:[%s775_s0] sm:$0xff]  ;;  %vm49_vm1 = vcmask 261120   ;;  %v99_v37 = vlaneseq }
   0x5   :  { %v24_v10 = vsel %vm23_vm0, %v19_v7, 0.0  ;;  %v74_v13 = vld [vmem:[%s776_s1] sm:$0xff]  ;;  %v29_v14 = vsel %vm23_vm0, %v22_v6, 0.0  ;;  %s475_s23 = sshll.u32 %s778_s3, 4  ;;  %s506_s26 = smov [#allocation2]   ;;  %s476_s23 = int_to_ptr.hbm [resolvable:$true] %s475_s23 }
   0x6   :  { %67 = vmatpush.msra.mxu0 %v16_v2  ;;  %v26_v11 = vadd.f32 %v25_v8, %v24_v10  ;;  %92 = vmatpush.msra.mxu1 %v16_v2  ;;  %v100_v38 = vand.u32 127, %v99_v37 }
   0x8   :  { %v28_v15 = vadd.f32 %v27_v9, %v26_v11  ;;  %68 = vmatpush.msra.mxu0 %v15_v5  ;;  %93 = vmatpush.msra.mxu1 %v15_v5  ;;  %v551_v39 = vcvt.s32.f32 %v100_v38 }
   0x9   :  { %485 = vmatmul.msk.f32.vlgmr.msra.gmra.mxu0 %vm49_vm1, %v48_v12  ;;  %486 = vmatmul.msk.f32.vlgmr.msra.gmra.mxu1 %vm49_vm1, %v74_v13 }
   0xa   :  { %v30_v16 = vadd.f32 %v29_v14, %v28_v15 }
   0xc   :  { %v31_v17 = vrot.slane %v30_v16, 4 }
   0xe   :  { %v32_v18 = vadd.f32 %v31_v17, %v30_v16 }
  0x10   :  { %v33_v19 = vrot.slane %v32_v18, 2 }
  0x12   :  { %v34_v20 = vadd.f32 %v33_v19, %v32_v18 }
  0x14   :  { %v35_v21 = vrot.slane %v34_v20, 1 }
  0x16   :  { %v36_v22 = vadd.f32 %v35_v21, %v34_v20 }
  0x18   :  { %v37_v23 = vmax.f32 %v36_v22, 1e-30 }
  0x1a   :  { %490 = vrsqrt.f32 %v37_v23  ;;  %vm44_vm2 = vweird.f32 %v37_v23 }
  0x20   :  { %v491_v24 = vpop.eup %490 }
  0x21   :  { %v39_v25 = vmul.f32 %v491_v24, %v37_v23  ;;  %vm45_vm3 = vweird.f32 %v491_v24 }
  0x22   :  { %vm46_vm4 = vmor %vm44_vm2, %vm45_vm3 }
  0x23   :  { %v40_v26 = vmul.f32 %v491_v24, %v39_v25 }
  0x25   :  { %v41_v27 = vmul.f32 0.5, %v40_v26 }
  0x27   :  { %v42_v28 = vsub.f32 1.5, %v41_v27 }
  0x29   :  { %v43_v29 = vmul.f32 %v491_v24, %v42_v28 }
  0x2b   :  { %v47_v30 = vsel %vm46_vm4, %v491_v24, %v43_v29 }
  0x86   :  { %v70_v31 = vpop.f32.mrf.mxu0  ;;  %v95_v33 = vpop.f32.mrf.mxu1 }
  0x87   :  { %v73_v32 = vmul.f32 %v70_v31, %v47_v30  ;;  %v98_v35 = vmul.f32 %v95_v33, %v47_v30 }
  0x89   :  { %v102_v34 = vsel %vm23_vm0, %v73_v32, inf  ;;  %v112_v36 = vsel %vm23_vm0, %v98_v35, inf }
  0x8a   :  { %103 = vmin.xlane.f32.xlu0 %v102_v34 }
  0x92   :  { %113 = vmin.xlane.f32.xlu0 %v112_v36 }
  0xfd   :  { %v104_v40 = vpop.xlane.xlu0 %103 }
  0xfe   :  { %vm105_vm5 = vcmp.eq.f32.partialorder %v73_v32, %v104_v40 }
  0xff   :  { %v106_v41 = vsel %vm105_vm5, %v551_v39, 16.0 }
 0x100   :  { %v107_v42 = vsel %vm23_vm0, %v106_v41, inf }
 0x101   :  { %108 = vmin.xlane.f32.xlu1 %v107_v42 }
 0x105   :  { %v114_v43 = vpop.xlane.xlu0 %113 }
 0x106   :  { %vm115_vm6 = vcmp.eq.f32.partialorder %v98_v35, %v114_v43  ;;  %v122_v55 = vsub.f32 %v104_v40, %v114_v43 }
 0x107   :  { %v116_v44 = vsel %vm115_vm6, %v551_v39, 16.0 }
 0x108   :  { %v117_v45 = vsel %vm23_vm0, %v116_v44, inf  ;;  %v123_v59 = vmul.f32 %v122_v55, %v122_v55 }
 0x109   :  { %118 = vmin.xlane.f32.xlu1 %v117_v45 }
 0x174   :  { %v109_v46 = vpop.xlane.xlu1 %108 }
 0x175   :  { %vm110_vm7 = vcmp.eq.f32.partialorder %v551_v39, %v109_v46 }
 0x176   :  { %v111_v47 = vsel %vm110_vm7, inf, %v73_v32 }
 0x177   :  { %v125_v48 = vsel %vm23_vm0, %v111_v47, inf }
 0x178   :  { %126 = vmin.xlane.f32.xlu2 %v125_v48 }
 0x17c   :  { %v119_v49 = vpop.xlane.xlu1 %118 }
 0x17d   :  { %vm120_vm8 = vcmp.eq.f32.partialorder %v551_v39, %v119_v49 }
 0x17e   :  { %v121_v50 = vsel %vm120_vm8, inf, %v98_v35 }
 0x17f   :  { %v135_v51 = vsel %vm23_vm0, %v121_v50, inf }
 0x180   :  { %136 = vmin.xlane.f32.xlu2 %v135_v51 }
 0x1eb   :  { %v127_v52 = vpop.xlane.xlu2 %126 }
 0x1ec   :  { %vm128_vm9 = vcmp.eq.f32.partialorder %v111_v47, %v127_v52 }
 0x1ed   :  { %v129_v53 = vsel %vm128_vm9, %v551_v39, 16.0 }
 0x1ee   :  { %v130_v54 = vsel %vm23_vm0, %v129_v53, inf }
 0x1ef   :  { %131 = vmin.xlane.f32.xlu0 %v130_v54 }
 0x1f3   :  { %v137_v56 = vpop.xlane.xlu2 %136 }
 0x1f4   :  { %vm138_vm10 = vcmp.eq.f32.partialorder %v121_v50, %v137_v56  ;;  %v145_v57 = vsub.f32 %v127_v52, %v137_v56 }
 0x1f5   :  { %v139_v58 = vsel %vm138_vm10, %v551_v39, 16.0 }
 0x1f6   :  { %v146_v60 = vmul.f32 %v145_v57, %v145_v57  ;;  %v140_v61 = vsel %vm23_vm0, %v139_v58, inf }
 0x1f7   :  { %141 = vmin.xlane.f32.xlu1 %v140_v61 }
 0x1f8   :  { %v565_v62 = vadd.f32 %v146_v60, %v123_v59 }
 0x262   :  { %v132_v63 = vpop.xlane.xlu0 %131 }
 0x263   :  { %vm133_vm11 = vcmp.eq.f32.partialorder %v551_v39, %v132_v63 }
 0x264   :  { %v134_v0 = vsel %vm133_vm11, inf, %v111_v47 }
 0x265   :  { %v148_v1 = vsel %vm23_vm0, %v134_v0, inf }
 0x266   :  { %149 = vmin.xlane.f32.xlu2 %v148_v1 }
 0x26a   :  { %v142_v2 = vpop.xlane.xlu1 %141 }
 0x26b   :  { %vm143_vm12 = vcmp.eq.f32.partialorder %v551_v39, %v142_v2 }
 0x26c   :  { %v144_v3 = vsel %vm143_vm12, inf, %v121_v50 }
 0x26d   :  { %v158_v4 = vsel %vm23_vm0, %v144_v3, inf }
 0x26e   :  { %159 = vmin.xlane.f32.xlu0 %v158_v4 }
 0x2d9   :  { %v571_v5 = vpop.xlane.xlu2 %149 }
 0x2da   :  { %vm151_vm13 = vcmp.eq.f32.partialorder %v134_v0, %v571_v5 }
 0x2db   :  { %v152_v6 = vsel %vm151_vm13, %v551_v39, 16.0 }
 0x2dc   :  { %v153_v7 = vsel %vm23_vm0, %v152_v6, inf }
 0x2dd   :  { %154 = vmin.xlane.f32.xlu1 %v153_v7 }
 0x2e1   :  { %v576_v8 = vpop.xlane.xlu0 %159 }
 0x2e2   :  { %vm161_vm14 = vcmp.eq.f32.partialorder %v144_v3, %v576_v8 }
 0x2e3   :  { %v162_v9 = vsel %vm161_vm14, %v551_v39, 16.0 }
 0x2e4   :  { %v163_v10 = vsel %vm23_vm0, %v162_v9, inf }
 0x2e5   :  { %164 = vmin.xlane.f32.xlu2 %v163_v10 }
 0x350   :  { %v155_v11 = vpop.xlane.xlu1 %154 }
 0x351   :  { %vm156_vm15 = vcmp.eq.f32.partialorder %v551_v39, %v155_v11 }
 0x352   :  { %v157_v12 = vsel %vm156_vm15, inf, %v134_v0 }
 0x353   :  { %v171_v13 = vsel %vm23_vm0, %v157_v12, inf }
 0x354   :  { %172 = vmin.xlane.f32.xlu0 %v171_v13 }
 0x358   :  { %v165_v14 = vpop.xlane.xlu2 %164 }
 0x359   :  { %vm166_vm1 = vcmp.eq.f32.partialorder %v551_v39, %v165_v14 }
 0x35a   :  { %v167_v15 = vsel %vm166_vm1, inf, %v144_v3 }
 0x35b   :  { %v181_v16 = vsel %vm23_vm0, %v167_v15, inf }
 0x35c   :  { %182 = vmin.xlane.f32.xlu1 %v181_v16 }
 0x3c7   :  { %v585_v17 = vpop.xlane.xlu0 %172 }
 0x3c8   :  { %vm174_vm2 = vcmp.eq.f32.partialorder %v157_v12, %v585_v17 }
 0x3c9   :  { %v175_v18 = vsel %vm174_vm2, %v551_v39, 16.0 }
 0x3ca   :  { %v176_v19 = vsel %vm23_vm0, %v175_v18, inf }
 0x3cb   :  { %177 = vmin.xlane.f32.xlu2 %v176_v19 }
 0x3cf   :  { %v590_v20 = vpop.xlane.xlu1 %182 }
 0x3d0   :  { %vm184_vm3 = vcmp.eq.f32.partialorder %v167_v15, %v590_v20 }
 0x3d1   :  { %v185_v21 = vsel %vm184_vm3, %v551_v39, 16.0 }
 0x3d2   :  { %v186_v22 = vsel %vm23_vm0, %v185_v21, inf }
 0x3d3   :  { %187 = vmin.xlane.f32.xlu0 %v186_v22 }
 0x43e   :  { %v178_v23 = vpop.xlane.xlu2 %177 }
 0x43f   :  { %vm179_vm4 = vcmp.eq.f32.partialorder %v551_v39, %v178_v23 }
 0x440   :  { %v180_v24 = vsel %vm179_vm4, inf, %v157_v12 }
 0x441   :  { %v194_v25 = vsel %vm23_vm0, %v180_v24, inf }
 0x442   :  { %195 = vmin.xlane.f32.xlu1 %v194_v25 }
 0x446   :  { %v188_v26 = vpop.xlane.xlu0 %187 }
 0x447   :  { %vm189_vm5 = vcmp.eq.f32.partialorder %v551_v39, %v188_v26 }
 0x448   :  { %v190_v27 = vsel %vm189_vm5, inf, %v167_v15 }
 0x449   :  { %v204_v28 = vsel %vm23_vm0, %v190_v27, inf }
 0x44a   :  { %205 = vmin.xlane.f32.xlu2 %v204_v28 }
 0x4b5   :  { %v599_v29 = vpop.xlane.xlu1 %195 }
 0x4b6   :  { %vm197_vm6 = vcmp.eq.f32.partialorder %v180_v24, %v599_v29 }
 0x4b7   :  { %v198_v30 = vsel %vm197_vm6, %v551_v39, 16.0 }
 0x4b8   :  { %v199_v31 = vsel %vm23_vm0, %v198_v30, inf }
 0x4b9   :  { %200 = vmin.xlane.f32.xlu0 %v199_v31 }
 0x4bd   :  { %v604_v32 = vpop.xlane.xlu2 %205 }
 0x4be   :  { %vm207_vm7 = vcmp.eq.f32.partialorder %v190_v27, %v604_v32 }
 0x4bf   :  { %v208_v33 = vsel %vm207_vm7, %v551_v39, 16.0 }
 0x4c0   :  { %v209_v34 = vsel %vm23_vm0, %v208_v33, inf }
 0x4c1   :  { %210 = vmin.xlane.f32.xlu1 %v209_v34 }
 0x52c   :  { %v201_v35 = vpop.xlane.xlu0 %200 }
 0x52d   :  { %vm202_vm8 = vcmp.eq.f32.partialorder %v551_v39, %v201_v35 }
 0x52e   :  { %v203_v36 = vsel %vm202_vm8, inf, %v180_v24 }
 0x52f   :  { %v217_v37 = vsel %vm23_vm0, %v203_v36, inf }
 0x530   :  { %218 = vmin.xlane.f32.xlu2 %v217_v37 }
 0x534   :  { %v211_v38 = vpop.xlane.xlu1 %210 }
 0x535   :  { %vm212_vm9 = vcmp.eq.f32.partialorder %v551_v39, %v211_v38 }
 0x536   :  { %v213_v40 = vsel %vm212_vm9, inf, %v190_v27 }
 0x537   :  { %v227_v41 = vsel %vm23_vm0, %v213_v40, inf }
 0x538   :  { %228 = vmin.xlane.f32.xlu0 %v227_v41 }
 0x5a3   :  { %v613_v42 = vpop.xlane.xlu2 %218 }
 0x5a4   :  { %vm220_vm10 = vcmp.eq.f32.partialorder %v203_v36, %v613_v42 }
 0x5a5   :  { %v221_v43 = vsel %vm220_vm10, %v551_v39, 16.0 }
 0x5a6   :  { %v222_v44 = vsel %vm23_vm0, %v221_v43, inf }
 0x5a7   :  { %223 = vmin.xlane.f32.xlu1 %v222_v44 }
 0x5ab   :  { %v618_v45 = vpop.xlane.xlu0 %228 }
 0x5ac   :  { %vm230_vm11 = vcmp.eq.f32.partialorder %v213_v40, %v618_v45 }
 0x5ad   :  { %v231_v46 = vsel %vm230_vm11, %v551_v39, 16.0 }
 0x5ae   :  { %v232_v47 = vsel %vm23_vm0, %v231_v46, inf }
 0x5af   :  { %233 = vmin.xlane.f32.xlu2 %v232_v47 }
 0x61a   :  { %v224_v48 = vpop.xlane.xlu1 %223 }
 0x61b   :  { %vm225_vm12 = vcmp.eq.f32.partialorder %v551_v39, %v224_v48 }
 0x61c   :  { %v226_v49 = vsel %vm225_vm12, inf, %v203_v36 }
 0x61d   :  { %v240_v50 = vsel %vm23_vm0, %v226_v49, inf }
 0x61e   :  { %241 = vmin.xlane.f32.xlu0 %v240_v50 }
 0x622   :  { %v234_v51 = vpop.xlane.xlu2 %233 }
 0x623   :  { %vm235_vm13 = vcmp.eq.f32.partialorder %v551_v39, %v234_v51 }
 0x624   :  { %v236_v52 = vsel %vm235_vm13, inf, %v213_v40 }
 0x625   :  { %v250_v53 = vsel %vm23_vm0, %v236_v52, inf }
 0x626   :  { %251 = vmin.xlane.f32.xlu1 %v250_v53 }
 0x691   :  { %v627_v54 = vpop.xlane.xlu0 %241 }
 0x692   :  { %vm243_vm14 = vcmp.eq.f32.partialorder %v226_v49, %v627_v54 }
 0x693   :  { %v244_v55 = vsel %vm243_vm14, %v551_v39, 16.0 }
 0x694   :  { %v245_v56 = vsel %vm23_vm0, %v244_v55, inf }
 0x695   :  { %246 = vmin.xlane.f32.xlu2 %v245_v56 }
 0x699   :  { %v632_v57 = vpop.xlane.xlu1 %251 }
 0x69a   :  { %vm253_vm15 = vcmp.eq.f32.partialorder %v236_v52, %v632_v57 }
 0x69b   :  { %v254_v58 = vsel %vm253_vm15, %v551_v39, 16.0 }
 0x69c   :  { %v255_v59 = vsel %vm23_vm0, %v254_v58, inf }
 0x69d   :  { %256 = vmin.xlane.f32.xlu0 %v255_v59 }
 0x708   :  { %v247_v60 = vpop.xlane.xlu2 %246 }
 0x709   :  { %vm248_vm1 = vcmp.eq.f32.partialorder %v551_v39, %v247_v60 }
 0x70a   :  { %v249_v61 = vsel %vm248_vm1, inf, %v226_v49 }
 0x70b   :  { %v263_v63 = vsel %vm23_vm0, %v249_v61, inf }
 0x70c   :  { %264 = vmin.xlane.f32.xlu1 %v263_v63 }
 0x710   :  { %v257_v0 = vpop.xlane.xlu0 %256 }
 0x711   :  { %vm258_vm2 = vcmp.eq.f32.partialorder %v551_v39, %v257_v0 }
 0x712   :  { %v259_v1 = vsel %vm258_vm2, inf, %v236_v52 }
 0x713   :  { %v273_v2 = vsel %vm23_vm0, %v259_v1, inf }
 0x714   :  { %274 = vmin.xlane.f32.xlu2 %v273_v2 }
 0x77f   :  { %v641_v3 = vpop.xlane.xlu1 %264 }
 0x780   :  { %vm266_vm3 = vcmp.eq.f32.partialorder %v249_v61, %v641_v3 }
 0x781   :  { %v267_v4 = vsel %vm266_vm3, %v551_v39, 16.0 }
 0x782   :  { %v268_v6 = vsel %vm23_vm0, %v267_v4, inf }
 0x783   :  { %269 = vmin.xlane.f32.xlu0 %v268_v6 }
 0x787   :  { %v646_v7 = vpop.xlane.xlu2 %274 }
 0x788   :  { %vm276_vm4 = vcmp.eq.f32.partialorder %v259_v1, %v646_v7 }
 0x789   :  { %v277_v9 = vsel %vm276_vm4, %v551_v39, 16.0 }
 0x78a   :  { %v278_v10 = vsel %vm23_vm0, %v277_v9, inf }
 0x78b   :  { %279 = vmin.xlane.f32.xlu1 %v278_v10 }
 0x7f6   :  { %v270_v11 = vpop.xlane.xlu0 %269 }
 0x7f7   :  { %vm271_vm5 = vcmp.eq.f32.partialorder %v551_v39, %v270_v11 }
 0x7f8   :  { %v272_v12 = vsel %vm271_vm5, inf, %v249_v61 }
 0x7f9   :  { %v286_v13 = vsel %vm23_vm0, %v272_v12, inf }
 0x7fa   :  { %287 = vmin.xlane.f32.xlu2 %v286_v13 }
 0x7fe   :  { %v280_v14 = vpop.xlane.xlu1 %279 }
 0x7ff   :  { %vm281_vm6 = vcmp.eq.f32.partialorder %v551_v39, %v280_v14 }
 0x800   :  { %v282_v15 = vsel %vm281_vm6, inf, %v259_v1 }
 0x801   :  { %v296_v16 = vsel %vm23_vm0, %v282_v15, inf }
 0x802   :  { %297 = vmin.xlane.f32.xlu0 %v296_v16 }
 0x86d   :  { %v655_v18 = vpop.xlane.xlu2 %287 }
 0x86e   :  { %vm289_vm7 = vcmp.eq.f32.partialorder %v272_v12, %v655_v18 }
 0x86f   :  { %v290_v19 = vsel %vm289_vm7, %v551_v39, 16.0 }
 0x870   :  { %v291_v21 = vsel %vm23_vm0, %v290_v19, inf }
 0x871   :  { %292 = vmin.xlane.f32.xlu1 %v291_v21 }
 0x875   :  { %v660_v22 = vpop.xlane.xlu0 %297 }
 0x876   :  { %vm299_vm8 = vcmp.eq.f32.partialorder %v282_v15, %v660_v22 }
 0x877   :  { %v300_v23 = vsel %vm299_vm8, %v551_v39, 16.0 }
 0x878   :  { %v301_v24 = vsel %vm23_vm0, %v300_v23, inf }
 0x879   :  { %302 = vmin.xlane.f32.xlu2 %v301_v24 }
 0x8e4   :  { %v293_v25 = vpop.xlane.xlu1 %292 }
 0x8e5   :  { %vm294_vm9 = vcmp.eq.f32.partialorder %v551_v39, %v293_v25 }
 0x8e6   :  { %v295_v26 = vsel %vm294_vm9, inf, %v272_v12 }
 0x8e7   :  { %v309_v27 = vsel %vm23_vm0, %v295_v26, inf }
 0x8e8   :  { %310 = vmin.xlane.f32.xlu0 %v309_v27 }
 0x8ec   :  { %v303_v28 = vpop.xlane.xlu2 %302 }
 0x8ed   :  { %vm304_vm10 = vcmp.eq.f32.partialorder %v551_v39, %v303_v28 }
 0x8ee   :  { %v305_v30 = vsel %vm304_vm10, inf, %v282_v15 }
 0x8ef   :  { %v319_v31 = vsel %vm23_vm0, %v305_v30, inf }
 0x8f0   :  { %320 = vmin.xlane.f32.xlu1 %v319_v31 }
 0x95b   :  { %v669_v33 = vpop.xlane.xlu0 %310 }
 0x95c   :  { %vm312_vm11 = vcmp.eq.f32.partialorder %v295_v26, %v669_v33 }
 0x95d   :  { %v313_v34 = vsel %vm312_vm11, %v551_v39, 16.0 }
 0x95e   :  { %v314_v35 = vsel %vm23_vm0, %v313_v34, inf }
 0x95f   :  { %315 = vmin.xlane.f32.xlu2 %v314_v35 }
 0x963   :  { %v674_v36 = vpop.xlane.xlu1 %320 }
 0x964   :  { %vm322_vm12 = vcmp.eq.f32.partialorder %v305_v30, %v674_v36 }
 0x965   :  { %v323_v37 = vsel %vm322_vm12, %v551_v39, 16.0 }
 0x966   :  { %v324_v38 = vsel %vm23_vm0, %v323_v37, inf }
 0x967   :  { %325 = vmin.xlane.f32.xlu0 %v324_v38 }
 0x9d2   :  { %v316_v40 = vpop.xlane.xlu2 %315 }
 0x9d3   :  { %vm317_vm13 = vcmp.eq.f32.partialorder %v551_v39, %v316_v40 }
 0x9d4   :  { %v318_v41 = vsel %vm317_vm13, inf, %v295_v26 }
 0x9d5   :  { %v332_v43 = vsel %vm23_vm0, %v318_v41, inf }
 0x9d6   :  { %333 = vmin.xlane.f32.xlu1 %v332_v43 }
 0x9da   :  { %v326_v44 = vpop.xlane.xlu0 %325 }
 0x9db   :  { %vm327_vm14 = vcmp.eq.f32.partialorder %v551_v39, %v326_v44 }
 0x9dc   :  { %v328_v46 = vsel %vm327_vm14, inf, %v305_v30 }
 0x9dd   :  { %v342_v47 = vsel %vm23_vm0, %v328_v46, inf }
 0x9de   :  { %343 = vmin.xlane.f32.xlu2 %v342_v47 }
 0xa49   :  { %v683_v48 = vpop.xlane.xlu1 %333 }
 0xa4a   :  { %vm335_vm15 = vcmp.eq.f32.partialorder %v318_v41, %v683_v48 }
 0xa4b   :  { %v336_v49 = vsel %vm335_vm15, %v551_v39, 16.0 }
 0xa4c   :  { %v337_v50 = vsel %vm23_vm0, %v336_v49, inf }
 0xa4d   :  { %338 = vmin.xlane.f32.xlu0 %v337_v50 }
 0xa51   :  { %v688_v51 = vpop.xlane.xlu2 %343 }
 0xa52   :  { %vm345_vm1 = vcmp.eq.f32.partialorder %v328_v46, %v688_v51 }
 0xa53   :  { %v346_v52 = vsel %vm345_vm1, %v551_v39, 16.0 }
 0xa54   :  { %v347_v53 = vsel %vm23_vm0, %v346_v52, inf }
 0xa55   :  { %348 = vmin.xlane.f32.xlu1 %v347_v53 }
 0xac0   :  { %v339_v55 = vpop.xlane.xlu0 %338 }
 0xac1   :  { %vm340_vm2 = vcmp.eq.f32.partialorder %v551_v39, %v339_v55 }
 0xac2   :  { %v341_v56 = vsel %vm340_vm2, inf, %v318_v41 }
 0xac3   :  { %v355_v58 = vsel %vm23_vm0, %v341_v56, inf }
 0xac4   :  { %356 = vmin.xlane.f32.xlu2 %v355_v58 }
 0xac8   :  { %v349_v59 = vpop.xlane.xlu1 %348 }
 0xac9   :  { %vm350_vm3 = vcmp.eq.f32.partialorder %v551_v39, %v349_v59 }
 0xaca   :  { %v351_v60 = vsel %vm350_vm3, inf, %v328_v46 }
 0xacb   :  { %v365_v61 = vsel %vm23_vm0, %v351_v60, inf }
 0xacc   :  { %366 = vmin.xlane.f32.xlu0 %v365_v61 }
 0xb37   :  { %v697_v63 = vpop.xlane.xlu2 %356 }
 0xb38   :  { %vm358_vm4 = vcmp.eq.f32.partialorder %v341_v56, %v697_v63 }
 0xb39   :  { %v359_v0 = vsel %vm358_vm4, %v551_v39, 16.0 }
 0xb3a   :  { %v360_v1 = vsel %vm23_vm0, %v359_v0, inf }
 0xb3b   :  { %361 = vmin.xlane.f32.xlu1 %v360_v1 }
 0xb3f   :  { %v702_v2 = vpop.xlane.xlu0 %366 }
 0xb40   :  { %vm368_vm5 = vcmp.eq.f32.partialorder %v351_v60, %v702_v2 }
 0xb41   :  { %v369_v4 = vsel %vm368_vm5, %v551_v39, 16.0 }
 0xb42   :  { %v370_v6 = vsel %vm23_vm0, %v369_v4, inf }
 0xb43   :  { %371 = vmin.xlane.f32.xlu2 %v370_v6 }
 0xbae   :  { %v362_v9 = vpop.xlane.xlu1 %361 }
 0xbaf   :  { %vm363_vm6 = vcmp.eq.f32.partialorder %v551_v39, %v362_v9  ;;  %v168_v9 = vsub.f32 %v571_v5, %v576_v8  ;;  %v283_v5 = vsub.f32 %v641_v3, %v646_v7  ;;  %v375_v3 = vsub.f32 %v697_v63, %v702_v2 }
 0xbb0   :  { %v364_v10 = vsel %vm363_vm6, inf, %v341_v56 }
 0xbb1   :  { %v378_v11 = vsel %vm23_vm0, %v364_v10, inf }
 0xbb2   :  { %379 = vmin.xlane.f32.xlu0 %v378_v11  ;;  %v169_v11 = vmul.f32 %v168_v9, %v168_v9 }
 0xbb6   :  { %v372_v12 = vpop.xlane.xlu2 %371 }
 0xbb7   :  { %vm373_vm7 = vcmp.eq.f32.partialorder %v551_v39, %v372_v12  ;;  %v214_v12 = vsub.f32 %v599_v29, %v604_v32  ;;  %v284_v32 = vmul.f32 %v283_v5, %v283_v5 }
 0xbb8   :  { %v374_v13 = vsel %vm373_vm7, inf, %v351_v60 }
 0xbb9   :  { %v388_v14 = vsel %vm23_vm0, %v374_v13, inf }
 0xbba   :  { %389 = vmin.xlane.f32.xlu1 %v388_v14  ;;  %v237_v14 = vsub.f32 %v613_v42, %v618_v45  ;;  %v329_v42 = vsub.f32 %v669_v33, %v674_v36 }
 0xc25   :  { %v711_v15 = vpop.xlane.xlu0 %379 }
 0xc26   :  { %vm381_vm8 = vcmp.eq.f32.partialorder %v364_v10, %v711_v15 }
 0xc27   :  { %v382_v16 = vsel %vm381_vm8, %v551_v39, 16.0 }
 0xc28   :  { %v383_v19 = vsel %vm23_vm0, %v382_v16, inf  ;;  %v215_v16 = vmul.f32 %v214_v12, %v214_v12 }
 0xc29   :  { %384 = vmin.xlane.f32.xlu2 %v383_v19  ;;  %v260_v19 = vsub.f32 %v627_v54, %v632_v57  ;;  %v352_v54 = vsub.f32 %v683_v48, %v688_v51 }
 0xc2d   :  { %v716_v21 = vpop.xlane.xlu1 %389 }
 0xc2e   :  { %vm391_vm9 = vcmp.eq.f32.partialorder %v374_v13, %v716_v21 }
 0xc2f   :  { %v392_v23 = vsel %vm391_vm9, %v551_v39, 16.0 }
 0xc30   :  { %v393_v24 = vsel %vm23_vm0, %v392_v23, inf }
 0xc31   :  { %394 = vmin.xlane.f32.xlu0 %v393_v24  ;;  %v238_v24 = vmul.f32 %v237_v14, %v237_v14 }
 0xc9c   :  { %v385_v25 = vpop.xlane.xlu2 %384 }
 0xc9d   :  { %vm386_vm10 = vcmp.eq.f32.partialorder %v551_v39, %v385_v25  ;;  %v330_v25 = vmul.f32 %v329_v42, %v329_v42 }
 0xc9e   :  { %v387_v26 = vsel %vm386_vm10, inf, %v364_v10  ;;  %v191_v10 = vsub.f32 %v585_v17, %v590_v20  ;;  %v261_v17 = vmul.f32 %v260_v19, %v260_v19  ;;  %v306_v20 = vsub.f32 %v655_v18, %v660_v22 }
 0xc9f   :  { %v401_v27 = vsel %vm23_vm0, %v387_v26, inf  ;;  %v398_v18 = vsub.f32 %v711_v15, %v716_v21 }
 0xca0   :  { %402 = vmin.xlane.f32.xlu1 %v401_v27  ;;  %v307_v45 = vmul.f32 %v306_v20, %v306_v20  ;;  %v376_v27 = vmul.f32 %v375_v3, %v375_v3 }
 0xca4   :  { %v395_v28 = vpop.xlane.xlu0 %394 }
 0xca5   :  { %vm396_vm11 = vcmp.eq.f32.partialorder %v551_v39, %v395_v28  ;;  %v399_v28 = vmul.f32 %v398_v18, %v398_v18 }
 0xca6   :  { %v397_v30 = vsel %vm396_vm11, inf, %v374_v13  ;;  %v192_v13 = vmul.f32 %v191_v10, %v191_v10 }
 0xca7   :  { %v411_v31 = vsel %vm23_vm0, %v397_v30, inf }
 0xca8   :  { %412 = vmin.xlane.f32.xlu2 %v411_v31 }
 0xd13   :  { %v725_v34 = vpop.xlane.xlu1 %402 }
 0xd14   :  { %vm404_vm12 = vcmp.eq.f32.partialorder %v387_v26, %v725_v34 }
 0xd15   :  { %v405_v35 = vsel %vm404_vm12, %v551_v39, 16.0 }
 0xd16   :  { %v406_v37 = vsel %vm23_vm0, %v405_v35, inf }
 0xd17   :  { %407 = vmin.xlane.f32.xlu0 %v406_v37 }
 0xd1b   :  { %v730_v38 = vpop.xlane.xlu2 %412 }
 0xd1c   :  { %vm414_vm13 = vcmp.eq.f32.partialorder %v397_v30, %v730_v38  ;;  %v421_v33 = vsub.f32 %v725_v34, %v730_v38 }
 0xd1d   :  { %v415_v40 = vsel %vm414_vm13, %v551_v39, 16.0 }
 0xd1e   :  { %v416_v41 = vsel %vm23_vm0, %v415_v40, inf  ;;  %v422_v48 = vmul.f32 %v421_v33, %v421_v33 }
 0xd1f   :  { %417 = vmin.xlane.f32.xlu1 %v416_v41 }
 0xd8a   :  { %v408_v43 = vpop.xlane.xlu0 %407 }
 0xd8b   :  { %vm409_vm14 = vcmp.eq.f32.partialorder %v551_v39, %v408_v43 }
 0xd8c   :  { %v410_v44 = vsel %vm409_vm14, inf, %v387_v26  ;;  %v353_v26 = vmul.f32 %v352_v54, %v352_v54 }
 0xd8d   :  { %v424_v46 = vsel %vm23_vm0, %v410_v44, inf }
 0xd8e   :  { %425 = vmin.xlane.f32.xlu2 %v424_v46 }
 0xd92   :  { %v418_v47 = vpop.xlane.xlu1 %417 }
 0xd93   :  { %vm419_vm15 = vcmp.eq.f32.partialorder %v551_v39, %v418_v47 }
 0xd94   :  { %v420_v49 = vsel %vm419_vm15, inf, %v397_v30 }
 0xd95   :  { %v434_v50 = vsel %vm23_vm0, %v420_v49, inf }
 0xd96   :  { %435 = vmin.xlane.f32.xlu0 %v434_v50 }
 0xe01   :  { %v426_v52 = vpop.xlane.xlu2 %425 }
 0xe02   :  { %vm427_vm1 = vcmp.eq.f32.partialorder %v410_v44, %v426_v52 }
 0xe03   :  { %v428_v53 = vsel %vm427_vm1, %v551_v39, 16.0 }
 0xe04   :  { %v429_v55 = vsel %vm23_vm0, %v428_v53, inf }
 0xe05   :  { %430 = vmin.xlane.f32.xlu1 %v429_v55 }
 0xe09   :  { %v436_v56 = vpop.xlane.xlu0 %435 }
 0xe0a   :  { %vm437_vm2 = vcmp.eq.f32.partialorder %v420_v49, %v436_v56  ;;  %v444_v30 = vsub.f32 %v426_v52, %v436_v56 }
 0xe0b   :  { %v438_v58 = vsel %vm437_vm2, %v551_v39, 16.0 }
 0xe0c   :  { %v439_v59 = vsel %vm23_vm0, %v438_v58, inf  ;;  %v445_v35 = vmul.f32 %v444_v30, %v444_v30 }
 0xe0d   :  { %440 = vmin.xlane.f32.xlu2 %v439_v59 }
 0xe78   :  { %v431_v60 = vpop.xlane.xlu1 %430 }
 0xe79   :  { %vm432_vm3 = vcmp.eq.f32.partialorder %v551_v39, %v431_v60 }
 0xe7a   :  { %v433_v61 = vsel %vm432_vm3, inf, %v410_v44 }
 0xe7b   :  { %v447_v0 = vsel %vm23_vm0, %v433_v61, inf }
 0xe7c   :  { %448 = vmin.xlane.f32.xlu0 %v447_v0 }
 0xe80   :  { %v441_v1 = vpop.xlane.xlu2 %440 }
 0xe81   :  { %vm442_vm4 = vcmp.eq.f32.partialorder %v551_v39, %v441_v1  ;;  %v170_v39 = vadd.f32 %v169_v11, %v565_v62 }
 0xe82   :  { %v443_v4 = vsel %vm442_vm4, inf, %v420_v49 }
 0xe83   :  { %v450_v6 = vsel %vm23_vm0, %v443_v4, inf  ;;  %v193_v23 = vadd.f32 %v192_v13, %v170_v39  ;;  %vm456_vm0 = vcmask 7168  }
 0xe84   :  { %451 = vmin.xlane.f32.xlu1 %v450_v6 }
 0xe85   :  { %v216_v8 = vadd.f32 %v215_v16, %v193_v23 }
 0xe87   :  { %v239_v29 = vadd.f32 %v238_v24, %v216_v8 }
 0xe89   :  { %v262_v62 = vadd.f32 %v261_v17, %v239_v29 }
 0xe8b   :  { %v285_v57 = vadd.f32 %v284_v32, %v262_v62 }
 0xe8d   :  { %v308_v7 = vadd.f32 %v307_v45, %v285_v57 }
 0xe8f   :  { %v331_v22 = vadd.f32 %v330_v25, %v308_v7 }
 0xe91   :  { %v354_v36 = vadd.f32 %v353_v26, %v331_v22 }
 0xe93   :  { %v377_v31 = vadd.f32 %v376_v27, %v354_v36 }
 0xe95   :  { %v400_v51 = vadd.f32 %v399_v28, %v377_v31 }
 0xe97   :  { %v423_v63 = vadd.f32 %v422_v48, %v400_v51 }
 0xe99   :  { %v446_v41 = vadd.f32 %v445_v35, %v423_v63 }
 0xeef   :  { %v449_v37 = vpop.xlane.xlu0 %448 }
 0xef7   :  { %v452_v40 = vpop.xlane.xlu1 %451 }
 0xef8   :  { %v453_v2 = vsub.f32 %v449_v37, %v452_v40 }
 0xefa   :  { %v454_v43 = vmul.f32 %v453_v2, %v453_v2 }
 0xefc   :  { %v455_v15 = vadd.f32 %v454_v43, %v446_v41 }
 0xefe   :  { %v457_v21 = vsel %vm456_vm0, %v455_v15, 0.0 }
 0xeff   :  { %458 = vadd.xlane.f32.xlu2 %v457_v21 }
 0xf72   :  { %v459_v44 = vpop.xlane.xlu2 %458 }
 0xf73   :  { %v460_v46 = vrot.slane %v459_v44, 4 }
 0xf75   :  { %v461_v34 = vadd.f32 %v460_v46, %v459_v44 }
 0xf77   :  { %v462_v38 = vrot.slane %v461_v34, 2 }
 0xf79   :  { %v463_v47 = vadd.f32 %v462_v38, %v461_v34 }
 0xf7b   :  { %v464_v49 = vrot.slane %v463_v47, 1 }
 0xf7d   :  { %v465_v50 = vadd.f32 %v464_v49, %v463_v47 }
 0xf7f   :  { %487 = vpush %v465_v50 }
 0xfb0   :  { %s488_s24 = spop %487 }
 0xfb1   :  { %s467_s25 = smul.f32 0.0078125, %s488_s24 }
 0xfb3   :  { %469 = sst [smem:[#allocation2]] %s467_s25 }
 0xfb4   :  { %478 = dma.smem_to_hbm %s506_s26, 16, %s476_s23, [#allocation3]  }
 0xfb5   :  { %504 = dma.done.wait [#allocation3], 16  }
 0xfb6   :  { %505 = vsyncadd [#allocation3], 4294967280 }
 0xfb7   :  { %483 = sfence }
 0xfb8   :  { %484 = vsyncpa [#allocation3], 1 }

</bundles_post_ra>
